<compile_context>
chip_gen: v7x
topology: tpu7x:2x2x1
jax: 0.10.0
libtpu: 0.0.40
codegen_flags: <defaults>
</compile_context>

<pallas_src>
import functools

import jax
import jax.numpy as jnp
from jax import lax
from jax.experimental import pallas as pl
from jax.experimental.pallas import tpu as pltpu


def policy_net_kernel(x_ref, wih_ref, whh_ref, b_ref,
                      w1_ref, b1_ref, w2_ref, b2_ref, w3_ref, b3_ref,
                      out_ref, *, seq_len, hidden):
    """Forward pass: LSTM over time, take last hidden state, 3-layer MLP."""
    tbp, _ = x_ref.shape
    bp = tbp // seq_len                   # padded batch (multiple of 8 sublanes)
    H = hidden                            # rnn_hidden_size

    x_flat = x_ref[...]                   # (T*Bp, I), time-major rows

    # --- Hoisted, PACKED input projection: one matmul over all timesteps,
    #     one (1, 4H) bias broadcast, all outside the recurrence. ---
    gx = jnp.dot(x_flat, wih_ref[...],
                 preferred_element_type=jnp.float32) + b_ref[...]   # (T*Bp, 4H)

    whh = whh_ref[...]                    # (H, 4H), lane-dense packed gates

    h = jnp.zeros((bp, H), jnp.float32)
    c = jnp.zeros((bp, H), jnp.float32)

    # --- Fully unrolled recurrence (seq_len is a small compile-time const).
    #     One lane-dense MXU matmul + one full-vreg sigmoid + one full-vreg
    #     tanh per step; gates extracted with static 32-lane slices.
    #     TODO(synk): for large T switch to lax.fori_loop(..., unroll=2..4)
    #     with pl.ds-indexed gx slices to bound vreg live ranges. ---
    for t in range(seq_len):
        lo = t * bp                       # sublane-group aligned static slice
        pre = gx[lo:lo + bp, :] + jnp.dot(h, whh,
                                          preferred_element_type=jnp.float32)
        sig = jax.nn.sigmoid(pre)         # one EUP chain over the full 128 lanes
        th = jnp.tanh(pre)                # one EUP chain over the full 128 lanes
        i_g = sig[:, 0:H]
        f_g = sig[:, H:2 * H]
        g_g = th[:, 2 * H:3 * H]
        o_g = sig[:, 3 * H:4 * H]
        c = f_g * c + i_g * g_g
        h = o_g * jnp.tanh(c)

    # --- fc_layers: Linear -> ReLU -> Linear -> ReLU -> Linear
    #     (kept at the padded batch width; real rows sliced in the wrapper). ---
    y = jnp.maximum(jnp.dot(h, w1_ref[...],
                            preferred_element_type=jnp.float32) + b1_ref[...], 0.0)
    y = jnp.maximum(jnp.dot(y, w2_ref[...],
                            preferred_element_type=jnp.float32) + b2_ref[...], 0.0)
    y = jnp.dot(y, w3_ref[...], preferred_element_type=jnp.float32) + b3_ref[...]

    out_ref[...] = y                      # padded (Bp, out) store, no in-kernel slice


def policy_network_forward(x, params):
    """x: (B, T, input_size) float32 (PyTorch batch_first convention)."""
    B, T, I = x.shape
    Bp = max(8, -(-B // 8) * 8)                        # pad batch to sublane group
    x_tm = jnp.transpose(x, (1, 0, 2))                 # (T, B, I) time-major
    if Bp != B:
        x_tm = jnp.pad(x_tm, ((0, 0), (0, Bp - B), (0, 0)))
    x_flat = x_tm.reshape(T * Bp, I)                   # (T*Bp, I)
    out_size = params["b3"].shape[-1]
    H = params["whh"].shape[0]

    vmem = pl.BlockSpec(memory_space=pltpu.MemorySpace.VMEM)
    args = (x_flat,
            params["wih"], params["whh"], params["b"],
            params["w1"], params["b1"], params["w2"], params["b2"],
            params["w3"], params["b3"])

    out = pl.pallas_call(
        functools.partial(policy_net_kernel, seq_len=T, hidden=H),
        out_shape=jax.ShapeDtypeStruct((Bp, out_size), jnp.float32),
        in_specs=[vmem] * len(args),
        out_specs=vmem,
    )(*args)
    return out[:B, :]                                  # drop padded batch rows


def init_params(key, input_size, output_size, hidden_layers, rnn_hidden):
    """Deterministic PyTorch-style uniform init.  Weights stored as (in, out);
    LSTM weights/biases packed over gates in order [i, f, g, o]; b = b_ih + b_hh."""
    H = rnn_hidden
    ks = jax.random.split(key, 10)

    def u(k, shape, bound):
        return jax.random.uniform(k, shape, jnp.float32, -bound, bound)

    lstm_b = 1.0 / jnp.sqrt(H)
    params = {
        "wih": u(ks[0], (input_size, 4 * H), lstm_b),        # W_ih^T, packed gates
        "whh": u(ks[1], (H, 4 * H), lstm_b),                 # W_hh^T, packed gates
        "b": u(ks[2], (1, 4 * H), lstm_b) + u(ks[3], (1, 4 * H), lstm_b),
    }

    h1, h2 = hidden_layers
    b1b = 1.0 / jnp.sqrt(H)
    b2b = 1.0 / jnp.sqrt(h1)
    b3b = 1.0 / jnp.sqrt(h2)
    params.update(
        w1=u(ks[4], (H, h1), b1b),  b1=u(ks[5], (1, h1), b1b),
        w2=u(ks[6], (h1, h2), b2b), b2=u(ks[7], (1, h2), b2b),
        w3=u(ks[8], (h2, output_size), b3b), b3=u(ks[9], (1, output_size), b3b),
    )
    return params


def reference_forward(x, p):
    """Pure-JAX reference with identical semantics (for correctness check)."""
    B, T, I = x.shape
    H = p["whh"].shape[0]
    wih, whh, b = p["wih"], p["whh"], p["b"][0]

    def step(carry, x_t):
        h, c = carry
        gates = x_t @ wih + h @ whh + b
        i = jax.nn.sigmoid(gates[:, :H])
        f = jax.nn.sigmoid(gates[:, H:2 * H])
        g = jnp.tanh(gates[:, 2 * H:3 * H])
        o = jax.nn.sigmoid(gates[:, 3 * H:])
        c = f * c + i * g
        h = o * jnp.tanh(c)
        return (h, c), None

    init = (jnp.zeros((B, H), jnp.float32), jnp.zeros((B, H), jnp.float32))
    (h, _), _ = lax.scan(step, init, jnp.transpose(x, (1, 0, 2)))
    y = jnp.maximum(h @ p["w1"] + p["b1"][0], 0.0)
    y = jnp.maximum(y @ p["w2"] + p["b2"][0], 0.0)
    return y @ p["w3"] + p["b3"][0]


if __name__ == "__main__":
    # Small shapes consistent with the module's forward: (batch, seq, input_size)
    B, T = 2, 8
    input_size, output_size = 8, 4
    hidden_layers = [32, 32]
    rnn_hidden = 32                       # 4*H = 128 -> lane-dense packed gates

    key = jax.random.PRNGKey(0)
    k_x, k_p = jax.random.split(key)
    x = jax.random.normal(k_x, (B, T, input_size), jnp.float32)
    params = init_params(k_p, input_size, output_size, hidden_layers, rnn_hidden)

    out = jax.block_until_ready(policy_network_forward(x, params))
    ref = jax.block_until_ready(reference_forward(x, params))

    assert out.shape == (B, output_size), out.shape
    assert jnp.allclose(out, ref, atol=1e-5, rtol=1e-5), (out, ref)
    print("KERNEL_OK")
</pallas_src>

<mosaic_0001>
module attributes {stable_mosaic.version = 11 : i64} {
  func.func @policy_net_kernel(%arg0: memref<64x8xf32, #tpu.memory_space<vmem>>, %arg1: memref<8x128xf32, #tpu.memory_space<vmem>>, %arg2: memref<32x128xf32, #tpu.memory_space<vmem>>, %arg3: memref<1x128xf32, #tpu.memory_space<vmem>>, %arg4: memref<32x32xf32, #tpu.memory_space<vmem>>, %arg5: memref<1x32xf32, #tpu.memory_space<vmem>>, %arg6: memref<32x32xf32, #tpu.memory_space<vmem>>, %arg7: memref<1x32xf32, #tpu.memory_space<vmem>>, %arg8: memref<32x4xf32, #tpu.memory_space<vmem>>, %arg9: memref<1x4xf32, #tpu.memory_space<vmem>>, %arg10: memref<8x4xf32, #tpu.memory_space<vmem>>) attributes {dimension_semantics = [], scalar_prefetch = 0 : i64, scratch_operands = 0 : i64, tpu.core_type = #tpu.core_type<tc>} {
    %c0 = arith.constant 0 : index
    %c0_0 = arith.constant 0 : index
    %0 = vector.load %arg0[%c0, %c0_0] : memref<64x8xf32, #tpu.memory_space<vmem>>, vector<64x8xf32>
    %c0_1 = arith.constant 0 : index
    %c0_2 = arith.constant 0 : index
    %1 = vector.load %arg1[%c0_1, %c0_2] : memref<8x128xf32, #tpu.memory_space<vmem>>, vector<8x128xf32>
    %cst = arith.constant dense<0.000000e+00> : vector<64x128xf32>
    %2 = tpu.matmul %0, %1, %cst {dimension_numbers = #tpu.dot_dimension_numbers<[1], [0], [0], [1], [0, 0, 1, 1], [], []>} : vector<64x8xf32>, vector<8x128xf32>, vector<64x128xf32> -> vector<64x128xf32>
    %c0_3 = arith.constant 0 : index
    %c0_4 = arith.constant 0 : index
    %3 = vector.load %arg3[%c0_3, %c0_4] : memref<1x128xf32, #tpu.memory_space<vmem>>, vector<1x128xf32>
    %4 = vector.broadcast %3 : vector<1x128xf32> to vector<64x128xf32>
    %5 = arith.addf %2, %4 : vector<64x128xf32>
    %c0_5 = arith.constant 0 : index
    %c0_6 = arith.constant 0 : index
    %6 = vector.load %arg2[%c0_5, %c0_6] : memref<32x128xf32, #tpu.memory_space<vmem>>, vector<32x128xf32>
    %cst_7 = arith.constant 0.000000e+00 : f32
    %7 = vector.broadcast %cst_7 : f32 to vector<8x32xf32>
    %cst_8 = arith.constant 0.000000e+00 : f32
    %8 = vector.broadcast %cst_8 : f32 to vector<8x32xf32>
    %9 = vector.extract_strided_slice %5 {offsets = [0, 0], sizes = [8, 128], strides = [1, 1]} : vector<64x128xf32> to vector<8x128xf32>
    %cst_9 = arith.constant dense<0.000000e+00> : vector<8x128xf32>
    %10 = tpu.matmul %7, %6, %cst_9 {dimension_numbers = #tpu.dot_dimension_numbers<[1], [0], [0], [1], [0, 0, 1, 1], [], []>} : vector<8x32xf32>, vector<32x128xf32>, vector<8x128xf32> -> vector<8x128xf32>
    %11 = arith.addf %9, %10 : vector<8x128xf32>
    %12 = arith.negf %11 : vector<8x128xf32>
    %13 = math.exp %12 : vector<8x128xf32>
    %cst_10 = arith.constant 1.000000e+00 : f32
    %14 = vector.broadcast %cst_10 : f32 to vector<8x128xf32>
    %15 = arith.addf %14, %13 : vector<8x128xf32>
    %16 = arith.divf %14, %15 : vector<8x128xf32>
    %17 = math.tanh %11 : vector<8x128xf32>
    %18 = vector.extract_strided_slice %16 {offsets = [0, 0], sizes = [8, 32], strides = [1, 1]} : vector<8x128xf32> to vector<8x32xf32>
    %19 = vector.extract_strided_slice %16 {offsets = [0, 32], sizes = [8, 32], strides = [1, 1]} : vector<8x128xf32> to vector<8x32xf32>
    %20 = vector.extract_strided_slice %17 {offsets = [0, 64], sizes = [8, 32], strides = [1, 1]} : vector<8x128xf32> to vector<8x32xf32>
    %21 = vector.extract_strided_slice %16 {offsets = [0, 96], sizes = [8, 32], strides = [1, 1]} : vector<8x128xf32> to vector<8x32xf32>
    %22 = arith.mulf %19, %8 : vector<8x32xf32>
    %23 = arith.mulf %18, %20 : vector<8x32xf32>
    %24 = arith.addf %22, %23 : vector<8x32xf32>
    %25 = math.tanh %24 : vector<8x32xf32>
    %26 = arith.mulf %21, %25 : vector<8x32xf32>
    %27 = vector.extract_strided_slice %5 {offsets = [8, 0], sizes = [8, 128], strides = [1, 1]} : vector<64x128xf32> to vector<8x128xf32>
    %cst_11 = arith.constant dense<0.000000e+00> : vector<8x128xf32>
    %28 = tpu.matmul %26, %6, %cst_11 {dimension_numbers = #tpu.dot_dimension_numbers<[1], [0], [0], [1], [0, 0, 1, 1], [], []>} : vector<8x32xf32>, vector<32x128xf32>, vector<8x128xf32> -> vector<8x128xf32>
    %29 = arith.addf %27, %28 : vector<8x128xf32>
    %30 = arith.negf %29 : vector<8x128xf32>
    %31 = math.exp %30 : vector<8x128xf32>
    %cst_12 = arith.constant 1.000000e+00 : f32
    %32 = vector.broadcast %cst_12 : f32 to vector<8x128xf32>
    %33 = arith.addf %32, %31 : vector<8x128xf32>
    %34 = arith.divf %32, %33 : vector<8x128xf32>
    %35 = math.tanh %29 : vector<8x128xf32>
    %36 = vector.extract_strided_slice %34 {offsets = [0, 0], sizes = [8, 32], strides = [1, 1]} : vector<8x128xf32> to vector<8x32xf32>
    %37 = vector.extract_strided_slice %34 {offsets = [0, 32], sizes = [8, 32], strides = [1, 1]} : vector<8x128xf32> to vector<8x32xf32>
    %38 = vector.extract_strided_slice %35 {offsets = [0, 64], sizes = [8, 32], strides = [1, 1]} : vector<8x128xf32> to vector<8x32xf32>
    %39 = vector.extract_strided_slice %34 {offsets = [0, 96], sizes = [8, 32], strides = [1, 1]} : vector<8x128xf32> to vector<8x32xf32>
    %40 = arith.mulf %37, %24 : vector<8x32xf32>
    %41 = arith.mulf %36, %38 : vector<8x32xf32>
    %42 = arith.addf %40, %41 : vector<8x32xf32>
    %43 = math.tanh %42 : vector<8x32xf32>
    %44 = arith.mulf %39, %43 : vector<8x32xf32>
    %45 = vector.extract_strided_slice %5 {offsets = [16, 0], sizes = [8, 128], strides = [1, 1]} : vector<64x128xf32> to vector<8x128xf32>
    %cst_13 = arith.constant dense<0.000000e+00> : vector<8x128xf32>
    %46 = tpu.matmul %44, %6, %cst_13 {dimension_numbers = #tpu.dot_dimension_numbers<[1], [0], [0], [1], [0, 0, 1, 1], [], []>} : vector<8x32xf32>, vector<32x128xf32>, vector<8x128xf32> -> vector<8x128xf32>
    %47 = arith.addf %45, %46 : vector<8x128xf32>
    %48 = arith.negf %47 : vector<8x128xf32>
    %49 = math.exp %48 : vector<8x128xf32>
    %cst_14 = arith.constant 1.000000e+00 : f32
    %50 = vector.broadcast %cst_14 : f32 to vector<8x128xf32>
    %51 = arith.addf %50, %49 : vector<8x128xf32>
    %52 = arith.divf %50, %51 : vector<8x128xf32>
    %53 = math.tanh %47 : vector<8x128xf32>
    %54 = vector.extract_strided_slice %52 {offsets = [0, 0], sizes = [8, 32], strides = [1, 1]} : vector<8x128xf32> to vector<8x32xf32>
    %55 = vector.extract_strided_slice %52 {offsets = [0, 32], sizes = [8, 32], strides = [1, 1]} : vector<8x128xf32> to vector<8x32xf32>
    %56 = vector.extract_strided_slice %53 {offsets = [0, 64], sizes = [8, 32], strides = [1, 1]} : vector<8x128xf32> to vector<8x32xf32>
    %57 = vector.extract_strided_slice %52 {offsets = [0, 96], sizes = [8, 32], strides = [1, 1]} : vector<8x128xf32> to vector<8x32xf32>
    %58 = arith.mulf %55, %42 : vector<8x32xf32>
    %59 = arith.mulf %54, %56 : vector<8x32xf32>
    %60 = arith.addf %58, %59 : vector<8x32xf32>
    %61 = math.tanh %60 : vector<8x32xf32>
    %62 = arith.mulf %57, %61 : vector<8x32xf32>
    %63 = vector.extract_strided_slice %5 {offsets = [24, 0], sizes = [8, 128], strides = [1, 1]} : vector<64x128xf32> to vector<8x128xf32>
    %cst_15 = arith.constant dense<0.000000e+00> : vector<8x128xf32>
    %64 = tpu.matmul %62, %6, %cst_15 {dimension_numbers = #tpu.dot_dimension_numbers<[1], [0], [0], [1], [0, 0, 1, 1], [], []>} : vector<8x32xf32>, vector<32x128xf32>, vector<8x128xf32> -> vector<8x128xf32>
    %65 = arith.addf %63, %64 : vector<8x128xf32>
    %66 = arith.negf %65 : vector<8x128xf32>
    %67 = math.exp %66 : vector<8x128xf32>
    %cst_16 = arith.constant 1.000000e+00 : f32
    %68 = vector.broadcast %cst_16 : f32 to vector<8x128xf32>
    %69 = arith.addf %68, %67 : vector<8x128xf32>
    %70 = arith.divf %68, %69 : vector<8x128xf32>
    %71 = math.tanh %65 : vector<8x128xf32>
    %72 = vector.extract_strided_slice %70 {offsets = [0, 0], sizes = [8, 32], strides = [1, 1]} : vector<8x128xf32> to vector<8x32xf32>
    %73 = vector.extract_strided_slice %70 {offsets = [0, 32], sizes = [8, 32], strides = [1, 1]} : vector<8x128xf32> to vector<8x32xf32>
    %74 = vector.extract_strided_slice %71 {offsets = [0, 64], sizes = [8, 32], strides = [1, 1]} : vector<8x128xf32> to vector<8x32xf32>
    %75 = vector.extract_strided_slice %70 {offsets = [0, 96], sizes = [8, 32], strides = [1, 1]} : vector<8x128xf32> to vector<8x32xf32>
    %76 = arith.mulf %73, %60 : vector<8x32xf32>
    %77 = arith.mulf %72, %74 : vector<8x32xf32>
    %78 = arith.addf %76, %77 : vector<8x32xf32>
    %79 = math.tanh %78 : vector<8x32xf32>
    %80 = arith.mulf %75, %79 : vector<8x32xf32>
    %81 = vector.extract_strided_slice %5 {offsets = [32, 0], sizes = [8, 128], strides = [1, 1]} : vector<64x128xf32> to vector<8x128xf32>
    %cst_17 = arith.constant dense<0.000000e+00> : vector<8x128xf32>
    %82 = tpu.matmul %80, %6, %cst_17 {dimension_numbers = #tpu.dot_dimension_numbers<[1], [0], [0], [1], [0, 0, 1, 1], [], []>} : vector<8x32xf32>, vector<32x128xf32>, vector<8x128xf32> -> vector<8x128xf32>
    %83 = arith.addf %81, %82 : vector<8x128xf32>
    %84 = arith.negf %83 : vector<8x128xf32>
    %85 = math.exp %84 : vector<8x128xf32>
    %cst_18 = arith.constant 1.000000e+00 : f32
    %86 = vector.broadcast %cst_18 : f32 to vector<8x128xf32>
    %87 = arith.addf %86, %85 : vector<8x128xf32>
    %88 = arith.divf %86, %87 : vector<8x128xf32>
    %89 = math.tanh %83 : vector<8x128xf32>
    %90 = vector.extract_strided_slice %88 {offsets = [0, 0], sizes = [8, 32], strides = [1, 1]} : vector<8x128xf32> to vector<8x32xf32>
    %91 = vector.extract_strided_slice %88 {offsets = [0, 32], sizes = [8, 32], strides = [1, 1]} : vector<8x128xf32> to vector<8x32xf32>
    %92 = vector.extract_strided_slice %89 {offsets = [0, 64], sizes = [8, 32], strides = [1, 1]} : vector<8x128xf32> to vector<8x32xf32>
    %93 = vector.extract_strided_slice %88 {offsets = [0, 96], sizes = [8, 32], strides = [1, 1]} : vector<8x128xf32> to vector<8x32xf32>
    %94 = arith.mulf %91, %78 : vector<8x32xf32>
    %95 = arith.mulf %90, %92 : vector<8x32xf32>
    %96 = arith.addf %94, %95 : vector<8x32xf32>
    %97 = math.tanh %96 : vector<8x32xf32>
    %98 = arith.mulf %93, %97 : vector<8x32xf32>
    %99 = vector.extract_strided_slice %5 {offsets = [40, 0], sizes = [8, 128], strides = [1, 1]} : vector<64x128xf32> to vector<8x128xf32>
    %cst_19 = arith.constant dense<0.000000e+00> : vector<8x128xf32>
    %100 = tpu.matmul %98, %6, %cst_19 {dimension_numbers = #tpu.dot_dimension_numbers<[1], [0], [0], [1], [0, 0, 1, 1], [], []>} : vector<8x32xf32>, vector<32x128xf32>, vector<8x128xf32> -> vector<8x128xf32>
    %101 = arith.addf %99, %100 : vector<8x128xf32>
    %102 = arith.negf %101 : vector<8x128xf32>
    %103 = math.exp %102 : vector<8x128xf32>
    %cst_20 = arith.constant 1.000000e+00 : f32
    %104 = vector.broadcast %cst_20 : f32 to vector<8x128xf32>
    %105 = arith.addf %104, %103 : vector<8x128xf32>
    %106 = arith.divf %104, %105 : vector<8x128xf32>
    %107 = math.tanh %101 : vector<8x128xf32>
    %108 = vector.extract_strided_slice %106 {offsets = [0, 0], sizes = [8, 32], strides = [1, 1]} : vector<8x128xf32> to vector<8x32xf32>
    %109 = vector.extract_strided_slice %106 {offsets = [0, 32], sizes = [8, 32], strides = [1, 1]} : vector<8x128xf32> to vector<8x32xf32>
    %110 = vector.extract_strided_slice %107 {offsets = [0, 64], sizes = [8, 32], strides = [1, 1]} : vector<8x128xf32> to vector<8x32xf32>
    %111 = vector.extract_strided_slice %106 {offsets = [0, 96], sizes = [8, 32], strides = [1, 1]} : vector<8x128xf32> to vector<8x32xf32>
    %112 = arith.mulf %109, %96 : vector<8x32xf32>
    %113 = arith.mulf %108, %110 : vector<8x32xf32>
    %114 = arith.addf %112, %113 : vector<8x32xf32>
    %115 = math.tanh %114 : vector<8x32xf32>
    %116 = arith.mulf %111, %115 : vector<8x32xf32>
    %117 = vector.extract_strided_slice %5 {offsets = [48, 0], sizes = [8, 128], strides = [1, 1]} : vector<64x128xf32> to vector<8x128xf32>
    %cst_21 = arith.constant dense<0.000000e+00> : vector<8x128xf32>
    %118 = tpu.matmul %116, %6, %cst_21 {dimension_numbers = #tpu.dot_dimension_numbers<[1], [0], [0], [1], [0, 0, 1, 1], [], []>} : vector<8x32xf32>, vector<32x128xf32>, vector<8x128xf32> -> vector<8x128xf32>
    %119 = arith.addf %117, %118 : vector<8x128xf32>
    %120 = arith.negf %119 : vector<8x128xf32>
    %121 = math.exp %120 : vector<8x128xf32>
    %cst_22 = arith.constant 1.000000e+00 : f32
    %122 = vector.broadcast %cst_22 : f32 to vector<8x128xf32>
    %123 = arith.addf %122, %121 : vector<8x128xf32>
    %124 = arith.divf %122, %123 : vector<8x128xf32>
    %125 = math.tanh %119 : vector<8x128xf32>
    %126 = vector.extract_strided_slice %124 {offsets = [0, 0], sizes = [8, 32], strides = [1, 1]} : vector<8x128xf32> to vector<8x32xf32>
    %127 = vector.extract_strided_slice %124 {offsets = [0, 32], sizes = [8, 32], strides = [1, 1]} : vector<8x128xf32> to vector<8x32xf32>
    %128 = vector.extract_strided_slice %125 {offsets = [0, 64], sizes = [8, 32], strides = [1, 1]} : vector<8x128xf32> to vector<8x32xf32>
    %129 = vector.extract_strided_slice %124 {offsets = [0, 96], sizes = [8, 32], strides = [1, 1]} : vector<8x128xf32> to vector<8x32xf32>
    %130 = arith.mulf %127, %114 : vector<8x32xf32>
    %131 = arith.mulf %126, %128 : vector<8x32xf32>
    %132 = arith.addf %130, %131 : vector<8x32xf32>
    %133 = math.tanh %132 : vector<8x32xf32>
    %134 = arith.mulf %129, %133 : vector<8x32xf32>
    %135 = vector.extract_strided_slice %5 {offsets = [56, 0], sizes = [8, 128], strides = [1, 1]} : vector<64x128xf32> to vector<8x128xf32>
    %cst_23 = arith.constant dense<0.000000e+00> : vector<8x128xf32>
    %136 = tpu.matmul %134, %6, %cst_23 {dimension_numbers = #tpu.dot_dimension_numbers<[1], [0], [0], [1], [0, 0, 1, 1], [], []>} : vector<8x32xf32>, vector<32x128xf32>, vector<8x128xf32> -> vector<8x128xf32>
    %137 = arith.addf %135, %136 : vector<8x128xf32>
    %138 = arith.negf %137 : vector<8x128xf32>
    %139 = math.exp %138 : vector<8x128xf32>
    %cst_24 = arith.constant 1.000000e+00 : f32
    %140 = vector.broadcast %cst_24 : f32 to vector<8x128xf32>
    %141 = arith.addf %140, %139 : vector<8x128xf32>
    %142 = arith.divf %140, %141 : vector<8x128xf32>
    %143 = math.tanh %137 : vector<8x128xf32>
    %144 = vector.extract_strided_slice %142 {offsets = [0, 0], sizes = [8, 32], strides = [1, 1]} : vector<8x128xf32> to vector<8x32xf32>
    %145 = vector.extract_strided_slice %142 {offsets = [0, 32], sizes = [8, 32], strides = [1, 1]} : vector<8x128xf32> to vector<8x32xf32>
    %146 = vector.extract_strided_slice %143 {offsets = [0, 64], sizes = [8, 32], strides = [1, 1]} : vector<8x128xf32> to vector<8x32xf32>
    %147 = vector.extract_strided_slice %142 {offsets = [0, 96], sizes = [8, 32], strides = [1, 1]} : vector<8x128xf32> to vector<8x32xf32>
    %148 = arith.mulf %145, %132 : vector<8x32xf32>
    %149 = arith.mulf %144, %146 : vector<8x32xf32>
    %150 = arith.addf %148, %149 : vector<8x32xf32>
    %151 = math.tanh %150 : vector<8x32xf32>
    %152 = arith.mulf %147, %151 : vector<8x32xf32>
    %c0_25 = arith.constant 0 : index
    %c0_26 = arith.constant 0 : index
    %153 = vector.load %arg4[%c0_25, %c0_26] : memref<32x32xf32, #tpu.memory_space<vmem>>, vector<32x32xf32>
    %cst_27 = arith.constant dense<0.000000e+00> : vector<8x32xf32>
    %154 = tpu.matmul %152, %153, %cst_27 {dimension_numbers = #tpu.dot_dimension_numbers<[1], [0], [0], [1], [0, 0, 1, 1], [], []>} : vector<8x32xf32>, vector<32x32xf32>, vector<8x32xf32> -> vector<8x32xf32>
    %c0_28 = arith.constant 0 : index
    %c0_29 = arith.constant 0 : index
    %155 = vector.load %arg5[%c0_28, %c0_29] : memref<1x32xf32, #tpu.memory_space<vmem>>, vector<1x32xf32>
    %156 = vector.broadcast %155 : vector<1x32xf32> to vector<8x32xf32>
    %157 = arith.addf %154, %156 : vector<8x32xf32>
    %cst_30 = arith.constant 0.000000e+00 : f32
    %158 = vector.broadcast %cst_30 : f32 to vector<8x32xf32>
    %159 = arith.maximumf %157, %158 : vector<8x32xf32>
    %c0_31 = arith.constant 0 : index
    %c0_32 = arith.constant 0 : index
    %160 = vector.load %arg6[%c0_31, %c0_32] : memref<32x32xf32, #tpu.memory_space<vmem>>, vector<32x32xf32>
    %cst_33 = arith.constant dense<0.000000e+00> : vector<8x32xf32>
    %161 = tpu.matmul %159, %160, %cst_33 {dimension_numbers = #tpu.dot_dimension_numbers<[1], [0], [0], [1], [0, 0, 1, 1], [], []>} : vector<8x32xf32>, vector<32x32xf32>, vector<8x32xf32> -> vector<8x32xf32>
    %c0_34 = arith.constant 0 : index
    %c0_35 = arith.constant 0 : index
    %162 = vector.load %arg7[%c0_34, %c0_35] : memref<1x32xf32, #tpu.memory_space<vmem>>, vector<1x32xf32>
    %163 = vector.broadcast %162 : vector<1x32xf32> to vector<8x32xf32>
    %164 = arith.addf %161, %163 : vector<8x32xf32>
    %cst_36 = arith.constant 0.000000e+00 : f32
    %165 = vector.broadcast %cst_36 : f32 to vector<8x32xf32>
    %166 = arith.maximumf %164, %165 : vector<8x32xf32>
    %c0_37 = arith.constant 0 : index
    %c0_38 = arith.constant 0 : index
    %167 = vector.load %arg8[%c0_37, %c0_38] : memref<32x4xf32, #tpu.memory_space<vmem>>, vector<32x4xf32>
    %cst_39 = arith.constant dense<0.000000e+00> : vector<8x4xf32>
    %168 = tpu.matmul %166, %167, %cst_39 {dimension_numbers = #tpu.dot_dimension_numbers<[1], [0], [0], [1], [0, 0, 1, 1], [], []>} : vector<8x32xf32>, vector<32x4xf32>, vector<8x4xf32> -> vector<8x4xf32>
    %c0_40 = arith.constant 0 : index
    %c0_41 = arith.constant 0 : index
    %169 = vector.load %arg9[%c0_40, %c0_41] : memref<1x4xf32, #tpu.memory_space<vmem>>, vector<1x4xf32>
    %170 = vector.broadcast %169 : vector<1x4xf32> to vector<8x4xf32>
    %171 = arith.addf %168, %170 : vector<8x4xf32>
    %c0_42 = arith.constant 0 : index
    %c0_43 = arith.constant 0 : index
    %172 = vector.load %arg10[%c0_42, %c0_43] : memref<8x4xf32, #tpu.memory_space<vmem>>, vector<8x4xf32>
    tpu.vector_store %arg10[%c0_42, %c0_43], %171 {strides = array<i32>} : memref<8x4xf32, #tpu.memory_space<vmem>>, vector<8x4xf32>,
    return
  }
}

</mosaic_0001>

<bundles_post_ra>
// kernel: tpu_custom_call.1
= control target key start
LH: loop header
LB: loop body
LE: loop exit
PB: predicated region body
PF: predicated region fallthrough
CT: control target
= control target key end

     0   :  { %vm51_vm0 = vcmask 64512   ;;  %v1610_v0 = vmov 0.0|0.0   ;;  %vm1611_vm1 = vmmov 0   ;;  %v1612_v4 = vmov 0.0   ;;  %s1613_s27 = smov 64   ;;  %s1897_s2 = inlined_call_operand.vmem [shape: f32[32,128], index: 2, kind: input, shape index: {}]   ;;  %s1898_s1 = inlined_call_operand.vmem [shape: f32[8,128], index: 1, kind: input, shape index: {}]   ;;  %s1899_s0 = inlined_call_operand.vmem [shape: f32[64,8], index: 0, kind: input, shape index: {}]   ;;  %s1900_s3 = inlined_call_operand.vmem [shape: f32[1,128], index: 3, kind: input, shape index: {}]   ;;  %s1901_s4 = inlined_call_operand.vmem [shape: f32[32,32], index: 4, kind: input, shape index: {}]   ;;  %s1902_s6 = inlined_call_operand.vmem [shape: f32[32,32], index: 6, kind: input, shape index: {}]   ;;  %s1903_s8 = inlined_call_operand.vmem [shape: f32[32,4], index: 8, kind: input, shape index: {}]   ;;  %s1904_s5 = inlined_call_operand.vmem [shape: f32[1,32], index: 5, kind: input, shape index: {}]   ;;  %s1905_s7 = inlined_call_operand.vmem [shape: f32[1,32], index: 7, kind: input, shape index: {}]   ;;  %s1906_s9 = inlined_call_operand.vmem [shape: f32[1,4], index: 9, kind: input, shape index: {}]   ;;  %s1907_s10 = inlined_call_operand.vmem [shape: f32[8,4], index: 10, kind: output, shape index: {}]  }
   0x1   :  { %1475 = vmatprep.subr.bf16.mxu1 %v1610_v0  ;;  %v181_v1 = vld [vmem:[%s1897_s2] sm:$0xff]  ;;  %v182_v2 = vld [vmem:[%s1897_s2 + $0x8] sm:$0xff]  ;;  %1362 = vmatprep.mubr.msk.f32.mxu1 %vm1611_vm1, %v1612_v4  ;;  %v183_v8 = vld [vmem:[%s1897_s2 + $0x10] sm:$0xff]  ;;  %vm185_vm2 = vcmask 261120   ;;  %vm1240_vm3 = vcmask 31744  }
   0x2   :  { %v43_v3 = vld [vmem:[%s1898_s1] sm:$0xff]  ;;  %v1682_v5 = vpack.c.bf16 %v182_v2, %v181_v1  ;;  %v36_v7 = vld [vmem:[%s1899_s0 + $0x8] sm:$0xff]  ;;  %v184_v9 = vld [vmem:[%s1897_s2 + $0x18] sm:$0xff] }
   0x3   :  { %1340 = vmatprep.subr.mxu0 %v43_v3  ;;  %v35_v6 = vld [vmem:[%s1899_s0] sm:$0xff]  ;;  %v1699_v10 = vpack.c.bf16 %v184_v9, %v183_v8  ;;  %v37_v46 = vld [vmem:[%s1899_s0 + $0x10] sm:$0xff]  ;;  %v38_v47 = vld [vmem:[%s1899_s0 + $0x18] sm:$0xff] }
   0x4   :  { %1341 = vmatpush3.msra.mxu0 %v43_v3  ;;  %1342 = vmatprep.mubr.msk.f32.mxu0 %vm51_vm0, %v35_v6  ;;  %v1719_v12 = vld [vmem:[%s1900_s3] ss:$0 sm:$0xff]  ;;  %s1614_s3 = smov 32   ;;  %v40_v49 = vld [vmem:[%s1899_s0 + $0x28] sm:$0xff]  ;;  %v41_v50 = vld [vmem:[%s1899_s0 + $0x30] sm:$0xff] }
   0x5   :  { %1477 = vmatpush3.bf16.msra.mxu1 %v1682_v5  ;;  %1343 = vmatmul.mubr.msk.f32.vlgmr.msra.gmra.mrb[0].mxu0 %vm51_vm0, %v36_v7  ;;  %v39_v48 = vld [vmem:[%s1899_s0 + $0x20] sm:$0xff]  ;;  %v42_v51 = vld [vmem:[%s1899_s0 + $0x38] sm:$0xff] }
   0x6   :  { %1478 = vmatprep.subr.bf16.mxu1 %v1610_v0  ;;  %1487 = vmatprep.subr.bf16.mxu0 %v1610_v0 }
   0x7   :  { %1489 = vmatpush3.bf16.msra.mxu0 %v1682_v5  ;;  %1345 = vmatprep.mubr.msk.f32.mxu0 %vm51_vm0, %v37_v46 }
   0x8   :  { %1490 = vmatprep.subr.bf16.mxu0 %v1610_v0 }
   0x9   :  { %1480 = vmatpush3.bf16.msra.mxu1 %v1699_v10  ;;  %1346 = vmatmul.mubr.msk.f32.gmra.mrb[2].mxu0 %vm51_vm0, %v38_v47 }
   0xa   :  { %1481 = vmatprep.subr.bf16.mxu1 %v1610_v0  ;;  %1348 = vmatprep.mubr.msk.f32.mxu0 %vm51_vm0, %v39_v48 }
   0xb   :  { %1492 = vmatpush3.bf16.msra.mxu0 %v1699_v10 }
   0xc   :  { %1363 = vmatmul.mubr.f32.vlgmr.msra.gmra.mrb[0].mxu1 %v1612_v4  ;;  %1499 = vmatprep.subr.bf16.mxu0 %v1610_v0 }
   0xd   :  { %1483 = vmatpush3.bf16.msra.mxu1 %v1682_v5  ;;  %1373 = vmatprep.mubr.msk.f32.mxu1 %vm1611_vm1, %v1612_v4 }
   0xe   :  { %1484 = vmatprep.subr.bf16.mxu1 %v1610_v0  ;;  %1349 = vmatmul.mubr.msk.f32.gmra.mrb[4].mxu0 %vm51_vm0, %v40_v49 }
   0xf   :  { %1351 = vmatprep.mubr.msk.f32.mxu0 %vm51_vm0, %v41_v50 }
  0x11   :  { %1486 = vmatpush3.bf16.msra.mxu1 %v1699_v10 }
  0x12   :  { %1493 = vmatprep.subr.bf16.mxu1 %v1610_v0  ;;  %1352 = vmatmul.mubr.msk.f32.gmra.mrb[6].mxu0 %vm51_vm0, %v42_v51 }
  0x13   :  { %1384 = vmatprep.mubr.msk.f32.mxu0 %vm1611_vm1, %v1612_v4 }
  0xd8   :  { %v1344_v11 = vpop.f32.mrb[0].mxu0 }
  0xd9   :  { %v142_v13 = vpop.f32.mrb[1].mxu0  ;;  %v148_v32 = vadd.f32 %v1344_v11, %v1719_v12 }
  0xda   :  { %v143_v14 = vadd.f32 %v1719_v12, %v142_v13 }
  0xdc   :  { %v1347_v55 = vpop.f32.mrb[2].mxu0 }
  0xdd   :  { %v152_v56 = vpop.f32.mrb[3].mxu0 }
  0xde   :  { %v153_v62 = vadd.f32 %v1719_v12, %v152_v56 }
  0xdf   :  { %v255_v15 = vpop.f32.mrb[0].mxu1 }
  0xe0   :  { %v259_v16 = vadd.f32 %v255_v15, %v143_v14  ;;  %v1364_v17 = vpop.f32.mrb[1].mxu1 }
  0xe1   :  { %v1764_v57 = vpop.f32.mrb[4].mxu0 }
  0xe2   :  { %1546 = vtanh.f32 %v259_v16  ;;  %v1255_v19 = vmul.f32 -1.442695, %v259_v16  ;;  %v1766_v58 = vpop.f32.mrb[5].mxu0 }
  0xe4   :  { %1548 = vpow2.f32 %v1255_v19 }
  0xe5   :  { %v1768_v59 = vpop.f32.mrb[6].mxu0 }
  0xe6   :  { %v1770_v60 = vpop.f32.mrb[7].mxu0 }
  0xec   :  { %v1547_v18 = vpop.eup %1546 }
  0xed   :  { %269 = vrot.lane.b32.xlu0 %v1547_v18, %s1613_s27 }
  0xee   :  { %v1549_v20 = vpop.eup %1548 }
  0xef   :  { %v263_v21 = vadd.f32 1.0, %v1549_v20 }
  0xf1   :  { %1550 = vrcp.f32 %v263_v21  ;;  %v158_v21 = vadd.f32 %v1347_v55, %v1719_v12 }
  0xfb   :  { %v1551_v22 = vpop.eup %1550 }
  0xfc   :  { %v267_v25 = vmul.f32 0.0, %v1551_v22 }
 0x15f   :  { %v270_v23 = vpop.permute.xlu0 %269 }
 0x160   :  { %v272_v24 = vmul.f32 %v1551_v22, %v270_v23 }
 0x162   :  { %274 = vrot.lane.b32.xlu0 %v272_v24, %s1614_s3 }
 0x1d4   :  { %v275_v26 = vpop.permute.xlu0 %274 }
 0x1d5   :  { %v277_v27 = vadd.f32 %v275_v26, %v267_v25 }
 0x1d7   :  { %1552 = vtanh.f32 %v277_v27 }
 0x1e1   :  { %v1553_v28 = vpop.eup %1552 }
 0x1e2   :  { %280 = vrot.lane.b32.xlu1 %v1553_v28, %s1613_s27 }
 0x254   :  { %v281_v29 = vpop.permute.xlu1 %280 }
 0x255   :  { %v283_v30 = vmul.f32 %v1551_v22, %v281_v29 }
 0x257   :  { %285 = vrot.lane.b32.xlu1 %v283_v30, %s1614_s3 }
 0x2c9   :  { %v286_v31 = vpop.permute.xlu1 %285 }
 0x2ca   :  { %1374 = vmatmul.mubr.msk.f32.vlgmr.msra.gmra.mrb[2].mxu1 %vm185_vm2, %v286_v31 }
 0x2cb   :  { %1495 = vmatpush3.bf16.msra.mxu1 %v1682_v5  ;;  %1395 = vmatprep.mubr.msk.f32.mxu1 %vm1611_vm1, %v1612_v4 }
 0x2cc   :  { %1496 = vmatprep.subr.bf16.mxu1 %v1610_v0 }
 0x2cf   :  { %1498 = vmatpush3.bf16.msra.mxu1 %v1699_v10 }
 0x2d0   :  { %1505 = vmatprep.subr.bf16.mxu1 %v1610_v0 }
 0x39d   :  { %v355_v33 = vpop.f32.mrb[2].mxu1 }
 0x39e   :  { %v359_v34 = vadd.f32 %v355_v33, %v148_v32  ;;  %v1375_v35 = vpop.f32.mrb[3].mxu1 }
 0x3a0   :  { %1554 = vtanh.f32 %v359_v34  ;;  %v1257_v37 = vmul.f32 -1.442695, %v359_v34 }
 0x3a2   :  { %1556 = vpow2.f32 %v1257_v37 }
 0x3aa   :  { %v1555_v36 = vpop.eup %1554 }
 0x3ab   :  { %369 = vrot.lane.b32.xlu0 %v1555_v36, %s1613_s27 }
 0x3ac   :  { %v1557_v38 = vpop.eup %1556 }
 0x3ad   :  { %v363_v39 = vadd.f32 1.0, %v1557_v38 }
 0x3af   :  { %1558 = vrcp.f32 %v363_v39  ;;  %v163_v39 = vadd.f32 %v1719_v12, %v1766_v58  ;;  %v168_v58 = vadd.f32 %v1764_v57, %v1719_v12 }
 0x3b9   :  { %v1559_v40 = vpop.eup %1558 }
 0x3ba   :  { %v367_v43 = vmul.f32 %v1559_v40, %v277_v27 }
 0x41d   :  { %v370_v41 = vpop.permute.xlu0 %369 }
 0x41e   :  { %v372_v42 = vmul.f32 %v1559_v40, %v370_v41 }
 0x420   :  { %374 = vrot.lane.b32.xlu1 %v372_v42, %s1614_s3 }
 0x492   :  { %v375_v44 = vpop.permute.xlu1 %374 }
 0x493   :  { %v377_v45 = vadd.f32 %v375_v44, %v367_v43 }
 0x495   :  { %1560 = vtanh.f32 %v377_v45 }
 0x49f   :  { %v1561_v52 = vpop.eup %1560 }
 0x4a0   :  { %380 = vrot.lane.b32.xlu0 %v1561_v52, %s1613_s27 }
 0x512   :  { %v381_v53 = vpop.permute.xlu0 %380 }
 0x513   :  { %v383_v54 = vmul.f32 %v1559_v40, %v381_v53 }
 0x515   :  { %385 = vrot.lane.b32.xlu1 %v383_v54, %s1614_s3 }
 0x587   :  { %v386_v61 = vpop.permute.xlu1 %385 }
 0x588   :  { %1385 = vmatmul.mubr.msk.f32.vlgmr.msra.gmra.mrb[8].mxu0 %vm185_vm2, %v386_v61 }
 0x589   :  { %1501 = vmatpush3.bf16.msra.mxu0 %v1682_v5  ;;  %1406 = vmatprep.mubr.msk.f32.mxu0 %vm1611_vm1, %v1612_v4 }
 0x58a   :  { %1502 = vmatprep.subr.bf16.mxu0 %v1610_v0 }
 0x58d   :  { %1504 = vmatpush3.bf16.msra.mxu0 %v1699_v10 }
 0x58e   :  { %1511 = vmatprep.subr.bf16.mxu0 %v1610_v0 }
 0x65b   :  { %v455_v63 = vpop.f32.mrb[8].mxu0 }
 0x65c   :  { %v459_v1 = vadd.f32 %v455_v63, %v153_v62  ;;  %v1386_v2 = vpop.f32.mrb[9].mxu0 }
 0x65e   :  { %1562 = vtanh.f32 %v459_v1  ;;  %v1259_v6 = vmul.f32 -1.442695, %v459_v1 }
 0x660   :  { %1564 = vpow2.f32 %v1259_v6 }
 0x668   :  { %v1563_v3 = vpop.eup %1562 }
 0x669   :  { %469 = vrot.lane.b32.xlu0 %v1563_v3, %s1613_s27 }
 0x66a   :  { %v1565_v7 = vpop.eup %1564 }
 0x66b   :  { %v463_v8 = vadd.f32 1.0, %v1565_v7 }
 0x66d   :  { %1566 = vrcp.f32 %v463_v8 }
 0x677   :  { %v1567_v9 = vpop.eup %1566 }
 0x678   :  { %v467_v14 = vmul.f32 %v1567_v9, %v377_v45 }
 0x6db   :  { %v470_v11 = vpop.permute.xlu0 %469 }
 0x6dc   :  { %v472_v13 = vmul.f32 %v1567_v9, %v470_v11 }
 0x6de   :  { %474 = vrot.lane.b32.xlu1 %v472_v13, %s1614_s3 }
 0x750   :  { %v475_v15 = vpop.permute.xlu1 %474 }
 0x751   :  { %v477_v16 = vadd.f32 %v475_v15, %v467_v14 }
 0x753   :  { %1568 = vtanh.f32 %v477_v16 }
 0x75d   :  { %v1569_v17 = vpop.eup %1568 }
 0x75e   :  { %480 = vrot.lane.b32.xlu0 %v1569_v17, %s1613_s27 }
 0x7d0   :  { %v481_v18 = vpop.permute.xlu0 %480 }
 0x7d1   :  { %v483_v19 = vmul.f32 %v1567_v9, %v481_v18 }
 0x7d3   :  { %485 = vrot.lane.b32.xlu1 %v483_v19, %s1614_s3 }
 0x845   :  { %v486_v20 = vpop.permute.xlu1 %485 }
 0x846   :  { %1396 = vmatmul.mubr.msk.f32.vlgmr.msra.gmra.mrb[4].mxu1 %vm185_vm2, %v486_v20 }
 0x847   :  { %1507 = vmatpush3.bf16.msra.mxu1 %v1682_v5  ;;  %1417 = vmatprep.mubr.msk.f32.mxu1 %vm1611_vm1, %v1612_v4 }
 0x848   :  { %1508 = vmatprep.subr.bf16.mxu1 %v1610_v0 }
 0x84b   :  { %1510 = vmatpush3.bf16.msra.mxu1 %v1699_v10 }
 0x84c   :  { %1517 = vmatprep.subr.bf16.mxu1 %v1610_v0 }
 0x919   :  { %v555_v22 = vpop.f32.mrb[4].mxu1 }
 0x91a   :  { %v559_v23 = vadd.f32 %v555_v22, %v158_v21  ;;  %v1397_v24 = vpop.f32.mrb[5].mxu1 }
 0x91c   :  { %1570 = vtanh.f32 %v559_v23  ;;  %v1261_v26 = vmul.f32 -1.442695, %v559_v23 }
 0x91e   :  { %1572 = vpow2.f32 %v1261_v26 }
 0x926   :  { %v1571_v25 = vpop.eup %1570 }
 0x927   :  { %569 = vrot.lane.b32.xlu0 %v1571_v25, %s1613_s27 }
 0x928   :  { %v1573_v27 = vpop.eup %1572 }
 0x929   :  { %v563_v28 = vadd.f32 1.0, %v1573_v27 }
 0x92b   :  { %1574 = vrcp.f32 %v563_v28 }
 0x935   :  { %v1575_v29 = vpop.eup %1574 }
 0x936   :  { %v567_v32 = vmul.f32 %v1575_v29, %v477_v16  ;;  %v173_v16 = vadd.f32 %v1719_v12, %v1770_v60 }
 0x999   :  { %v570_v30 = vpop.permute.xlu0 %569 }
 0x99a   :  { %v572_v31 = vmul.f32 %v1575_v29, %v570_v30 }
 0x99c   :  { %574 = vrot.lane.b32.xlu1 %v572_v31, %s1614_s3 }
 0xa0e   :  { %v575_v33 = vpop.permute.xlu1 %574 }
 0xa0f   :  { %v577_v34 = vadd.f32 %v575_v33, %v567_v32  ;;  %v178_v33 = vadd.f32 %v1768_v59, %v1719_v12  ;;  %v984_v59 = vld [vmem:[%s1901_s4] sm:$0xff] }
 0xa11   :  { %1576 = vtanh.f32 %v577_v34 }
 0xa1b   :  { %v1577_v35 = vpop.eup %1576 }
 0xa1c   :  { %580 = vrot.lane.b32.xlu0 %v1577_v35, %s1613_s27 }
 0xa8e   :  { %v581_v36 = vpop.permute.xlu0 %580 }
 0xa8f   :  { %v583_v37 = vmul.f32 %v1575_v29, %v581_v36 }
 0xa91   :  { %585 = vrot.lane.b32.xlu1 %v583_v37, %s1614_s3 }
 0xb03   :  { %v586_v38 = vpop.permute.xlu1 %585 }
 0xb04   :  { %1407 = vmatmul.mubr.msk.f32.vlgmr.msra.gmra.mrb[10].mxu0 %vm185_vm2, %v586_v38 }
 0xb05   :  { %1513 = vmatpush3.bf16.msra.mxu0 %v1682_v5  ;;  %1428 = vmatprep.mubr.msk.f32.mxu0 %vm1611_vm1, %v1612_v4 }
 0xb06   :  { %1514 = vmatprep.subr.bf16.mxu0 %v1610_v0 }
 0xb09   :  { %1516 = vmatpush3.bf16.msra.mxu0 %v1699_v10 }
 0xb0a   :  { %1523 = vmatprep.subr.bf16.mxu0 %v1610_v0 }
 0xbd7   :  { %v655_v40 = vpop.f32.mrb[10].mxu0 }
 0xbd8   :  { %v659_v41 = vadd.f32 %v655_v40, %v163_v39  ;;  %v1408_v42 = vpop.f32.mrb[11].mxu0 }
 0xbda   :  { %1578 = vtanh.f32 %v659_v41  ;;  %v1263_v44 = vmul.f32 -1.442695, %v659_v41 }
 0xbdc   :  { %1580 = vpow2.f32 %v1263_v44 }
 0xbe4   :  { %v1579_v43 = vpop.eup %1578 }
 0xbe5   :  { %669 = vrot.lane.b32.xlu0 %v1579_v43, %s1613_s27 }
 0xbe6   :  { %v1581_v45 = vpop.eup %1580 }
 0xbe7   :  { %v663_v46 = vadd.f32 1.0, %v1581_v45 }
 0xbe9   :  { %1582 = vrcp.f32 %v663_v46  ;;  %v985_v46 = vld [vmem:[%s1901_s4 + $0x8] sm:$0xff] }
 0xbf3   :  { %v1583_v47 = vpop.eup %1582 }
 0xbf4   :  { %v667_v50 = vmul.f32 %v1583_v47, %v577_v34 }
 0xc57   :  { %v670_v48 = vpop.permute.xlu0 %669 }
 0xc58   :  { %v672_v49 = vmul.f32 %v1583_v47, %v670_v48  ;;  %v1524_v48 = vpack.c.bf16 %v985_v46, %v984_v59 }
 0xc5a   :  { %674 = vrot.lane.b32.xlu1 %v672_v49, %s1614_s3  ;;  %v987_v49 = vld [vmem:[%s1901_s4 + $0x18] sm:$0xff] }
 0xccc   :  { %v675_v51 = vpop.permute.xlu1 %674 }
 0xccd   :  { %v677_v52 = vadd.f32 %v675_v51, %v667_v50 }
 0xccf   :  { %1584 = vtanh.f32 %v677_v52 }
 0xcd9   :  { %v1585_v53 = vpop.eup %1584 }
 0xcda   :  { %680 = vrot.lane.b32.xlu0 %v1585_v53, %s1613_s27  ;;  %v1072_v53 = vld [vmem:[%s1902_s6 + $0x8] sm:$0xff] }
 0xd4c   :  { %v681_v54 = vpop.permute.xlu0 %680 }
 0xd4d   :  { %v683_v55 = vmul.f32 %v1583_v47, %v681_v54  ;;  %v986_v47 = vld [vmem:[%s1901_s4 + $0x10] sm:$0xff] }
 0xd4e   :  { %v1527_v50 = vpack.c.bf16 %v987_v49, %v986_v47 }
 0xd4f   :  { %685 = vrot.lane.b32.xlu1 %v683_v55, %s1614_s3 }
 0xdc1   :  { %v686_v56 = vpop.permute.xlu1 %685 }
 0xdc2   :  { %1418 = vmatmul.mubr.msk.f32.vlgmr.msra.gmra.mrb[6].mxu1 %vm185_vm2, %v686_v56 }
 0xdc3   :  { %1519 = vmatpush3.bf16.msra.mxu1 %v1682_v5  ;;  %1439 = vmatprep.mubr.msk.f32.mxu1 %vm1611_vm1, %v1612_v4 }
 0xdc4   :  { %1520 = vmatprep.subr.bf16.mxu1 %v1610_v0 }
 0xdc7   :  { %1522 = vmatpush3.bf16.msra.mxu1 %v1699_v10 }
 0xdc8   :  { %1529 = vmatprep.subr.bf16.mxu1 %v1610_v0 }
 0xe95   :  { %v755_v61 = vpop.f32.mrb[6].mxu1 }
 0xe96   :  { %v759_v62 = vadd.f32 %v755_v61, %v168_v58  ;;  %v1419_v63 = vpop.f32.mrb[7].mxu1  ;;  %v1073_v61 = vld [vmem:[%s1902_s6 + $0x10] sm:$0xff] }
 0xe98   :  { %1586 = vtanh.f32 %v759_v62  ;;  %v1265_v5 = vmul.f32 -1.442695, %v759_v62  ;;  %v1074_v62 = vld [vmem:[%s1902_s6 + $0x18] sm:$0xff] }
 0xe99   :  { %v1533_v63 = vpack.c.bf16 %v1074_v62, %v1073_v61 }
 0xe9a   :  { %1588 = vpow2.f32 %v1265_v5  ;;  %v1157_v5 = vld [vmem:[%s1903_s8 + $0x8] sm:$0xff] }
 0xea2   :  { %v1587_v1 = vpop.eup %1586 }
 0xea3   :  { %769 = vrot.lane.b32.xlu0 %v1587_v1, %s1613_s27  ;;  %v1156_v1 = vld [vmem:[%s1903_s8] sm:$0xff] }
 0xea4   :  { %v1589_v2 = vpop.eup %1588 }
 0xea5   :  { %v763_v3 = vadd.f32 1.0, %v1589_v2  ;;  %v1536_v2 = vpack.c.bf16 %v1157_v5, %v1156_v1 }
 0xea7   :  { %1590 = vrcp.f32 %v763_v3 }
 0xeb1   :  { %v1591_v6 = vpop.eup %1590 }
 0xeb2   :  { %v767_v8 = vmul.f32 %v1591_v6, %v677_v52  ;;  %v1071_v52 = vld [vmem:[%s1902_s6] sm:$0xff] }
 0xeb3   :  { %v1530_v54 = vpack.c.bf16 %v1072_v53, %v1071_v52 }
 0xf15   :  { %v770_v7 = vpop.permute.xlu0 %769 }
 0xf16   :  { %v772_v10 = vmul.f32 %v1591_v6, %v770_v7 }
 0xf18   :  { %774 = vrot.lane.b32.xlu1 %v772_v10, %s1614_s3 }
 0xf8a   :  { %v775_v9 = vpop.permute.xlu1 %774 }
 0xf8b   :  { %v777_v57 = vadd.f32 %v775_v9, %v767_v8  ;;  %v1158_v8 = vld [vmem:[%s1903_s8 + $0x10] sm:$0xff]  ;;  %v1159_v9 = vld [vmem:[%s1903_s8 + $0x18] sm:$0xff] }
 0xf8d   :  { %1592 = vtanh.f32 %v777_v57 }
 0xf97   :  { %v1593_v11 = vpop.eup %1592 }
 0xf98   :  { %780 = vrot.lane.b32.xlu0 %v1593_v11, %s1613_s27 }
0x100a   :  { %v781_v13 = vpop.permute.xlu0 %780 }
0x100b   :  { %v783_v14 = vmul.f32 %v1591_v6, %v781_v13 }
0x100d   :  { %785 = vrot.lane.b32.xlu1 %v783_v14, %s1614_s3 }
0x107f   :  { %v786_v15 = vpop.permute.xlu1 %785 }
0x1080   :  { %1429 = vmatmul.mubr.msk.f32.vlgmr.msra.gmra.mrb[12].mxu0 %vm185_vm2, %v786_v15 }
0x1081   :  { %1450 = vmatprep.mubr.msk.f32.mxu0 %vm1611_vm1, %v1612_v4  ;;  %1525 = vmatpush3.bf16.msra.mxu0 %v1524_v48 }
0x1082   :  { %1526 = vmatprep.subr.bf16.mxu0 %v1610_v0 }
0x1085   :  { %1528 = vmatpush3.bf16.msra.mxu0 %v1527_v50 }
0x1086   :  { %1535 = vmatprep.subr.bf16.mxu0 %v1610_v0 }
0x1153   :  { %v855_v17 = vpop.f32.mrb[12].mxu0 }
0x1154   :  { %v859_v18 = vadd.f32 %v855_v17, %v173_v16  ;;  %v1430_v19 = vpop.f32.mrb[13].mxu0  ;;  %v1274_v16 = vld [vmem:[%s1906_s9] ss:$0 sm:$0xff] }
0x1156   :  { %1594 = vtanh.f32 %v859_v18  ;;  %v1267_v21 = vmul.f32 -1.442695, %v859_v18 }
0x1158   :  { %1596 = vpow2.f32 %v1267_v21 }
0x1160   :  { %v1595_v20 = vpop.eup %1594 }
0x1161   :  { %869 = vrot.lane.b32.xlu0 %v1595_v20, %s1613_s27 }
0x1162   :  { %v1597_v22 = vpop.eup %1596 }
0x1163   :  { %v863_v23 = vadd.f32 1.0, %v1597_v22 }
0x1165   :  { %1598 = vrcp.f32 %v863_v23 }
0x116f   :  { %v1599_v24 = vpop.eup %1598 }
0x1170   :  { %v867_v27 = vmul.f32 %v1599_v24, %v777_v57  ;;  %v1539_v57 = vpack.c.bf16 %v1159_v9, %v1158_v8 }
0x11d3   :  { %v870_v25 = vpop.permute.xlu0 %869 }
0x11d4   :  { %v872_v26 = vmul.f32 %v1599_v24, %v870_v25 }
0x11d6   :  { %874 = vrot.lane.b32.xlu1 %v872_v26, %s1614_s3 }
0x1248   :  { %v875_v28 = vpop.permute.xlu1 %874 }
0x1249   :  { %v877_v60 = vadd.f32 %v875_v28, %v867_v27 }
0x124b   :  { %1600 = vtanh.f32 %v877_v60 }
0x1255   :  { %v1601_v29 = vpop.eup %1600 }
0x1256   :  { %880 = vrot.lane.b32.xlu0 %v1601_v29, %s1613_s27 }
0x12c8   :  { %v881_v30 = vpop.permute.xlu0 %880 }
0x12c9   :  { %v883_v31 = vmul.f32 %v1599_v24, %v881_v30 }
0x12cb   :  { %885 = vrot.lane.b32.xlu1 %v883_v31, %s1614_s3 }
0x133d   :  { %v886_v32 = vpop.permute.xlu1 %885 }
0x133e   :  { %1440 = vmatmul.mubr.msk.f32.vlgmr.msra.gmra.mrb[8].mxu1 %vm185_vm2, %v886_v32 }
0x133f   :  { %1461 = vmatprep.mubr.msk.f32.mxu1 %vm1611_vm1, %v1612_v4  ;;  %1531 = vmatpush3.bf16.msra.mxu1 %v1530_v54 }
0x1340   :  { %1532 = vmatprep.subr.bf16.mxu1 %v1610_v0 }
0x1343   :  { %1534 = vmatpush3.bf16.msra.mxu1 %v1533_v63 }
0x1411   :  { %v955_v34 = vpop.f32.mrb[8].mxu1 }
0x1412   :  { %v959_v35 = vadd.f32 %v955_v34, %v178_v33  ;;  %v1441_v36 = vpop.f32.mrb[9].mxu1 }
0x1414   :  { %1602 = vtanh.f32 %v959_v35  ;;  %v1269_v38 = vmul.f32 -1.442695, %v959_v35 }
0x1416   :  { %1604 = vpow2.f32 %v1269_v38 }
0x141e   :  { %v1603_v37 = vpop.eup %1602 }
0x141f   :  { %969 = vrot.lane.b32.xlu0 %v1603_v37, %s1613_s27 }
0x1420   :  { %v1605_v39 = vpop.eup %1604 }
0x1421   :  { %v963_v40 = vadd.f32 1.0, %v1605_v39 }
0x1423   :  { %1606 = vrcp.f32 %v963_v40 }
0x142d   :  { %v1607_v41 = vpop.eup %1606 }
0x142e   :  { %v967_v44 = vmul.f32 %v1607_v41, %v877_v60 }
0x1491   :  { %v970_v42 = vpop.permute.xlu0 %969 }
0x1492   :  { %v972_v43 = vmul.f32 %v1607_v41, %v970_v42 }
0x1494   :  { %974 = vrot.lane.b32.xlu1 %v972_v43, %s1614_s3 }
0x1506   :  { %v975_v45 = vpop.permute.xlu1 %974 }
0x1507   :  { %v977_v12 = vadd.f32 %v975_v45, %v967_v44 }
0x1509   :  { %1608 = vtanh.f32 %v977_v12 }
0x1513   :  { %v1609_v51 = vpop.eup %1608 }
0x1514   :  { %980 = vrot.lane.b32.xlu0 %v1609_v51, %s1613_s27 }
0x1586   :  { %v981_v55 = vpop.permute.xlu0 %980 }
0x1587   :  { %v983_v56 = vmul.f32 %v1607_v41, %v981_v55 }
0x1589   :  { %996 = vrot.lane.b32.xlu1 %v983_v56, %s1614_s3 }
0x15fb   :  { %v997_v58 = vpop.permute.xlu1 %996 }
0x15fc   :  { %1451 = vmatmul.mubr.msk.f32.vlgmr.msra.gmra.mrb[14].mxu0 %vm185_vm2, %v997_v58 }
0x15fd   :  { %1472 = vmatprep.mubr.msk.f32.mxu0 %vm1611_vm1, %v1612_v4  ;;  %1537 = vmatpush3.bf16.msra.mxu0 %v1536_v2  ;;  %v1270_v4 = vld [vmem:[%s1904_s5] ss:$0 sm:$0xff] }
0x15fe   :  { %1538 = vmatprep.subr.bf16.mxu0 %v1610_v0  ;;  %v1272_v0 = vld [vmem:[%s1905_s7] ss:$0 sm:$0xff] }
0x1601   :  { %1540 = vmatpush3.bf16.msra.mxu0 %v1539_v57 }
0x16cf   :  { %v1066_v3 = vpop.f32.mrb[14].mxu0 }
0x16d0   :  { %v1067_v6 = vadd.f32 %v1270_v4, %v1066_v3  ;;  %v1452_v7 = vpop.f32.mrb[15].mxu0 }
0x16d2   :  { %v1070_v10 = vmax.f32 %v1067_v6, 0.0 }
0x16d4   :  { %1462 = vmatmul.mubr.msk.f32.vlgmr.msra.gmra.mrb[10].mxu1 %vm185_vm2, %v1070_v10 }
0x17a7   :  { %v1151_v11 = vpop.f32.mrb[10].mxu1 }
0x17a8   :  { %v1152_v13 = vadd.f32 %v1272_v0, %v1151_v11  ;;  %v1463_v14 = vpop.f32.mrb[11].mxu1 }
0x17aa   :  { %v1155_v15 = vmax.f32 %v1152_v13, 0.0 }
0x17ac   :  { %1473 = vmatmul.mubr.msk.f32.vlgmr.msra.gmra.mrb[16].mxu0 %vm185_vm2, %v1155_v15 }
0x187f   :  { %v1236_v17 = vpop.f32.mrb[16].mxu0 }
0x1880   :  { %v1237_v18 = vadd.f32 %v1274_v16, %v1236_v17  ;;  %v1474_v19 = vpop.f32.mrb[17].mxu0 }
0x1882   :  { %1241 = vst.msk [vmem:[%s1907_s10] sm:$0xff] %vm1240_vm3, %v1237_v18 }

</bundles_post_ra>
